<compile_context>
chip_gen: v7x
topology: tpu7x:2x2x1
jax: 0.10.0
libtpu: 0.0.40
codegen_flags: <defaults>
</compile_context>

<pallas_src>
import jax
import jax.numpy as jnp
from jax import lax
from jax.experimental import pallas as pl
from jax.experimental.pallas import tpu as pltpu

NUM_ACTIVATIONS = 8          # ids 0..7

_CHUNK_ELEMS = 1 << 17       # 128K f32 elems (512 KiB) per in-kernel compute chunk


def _round_up(a, m):
    return (a + m - 1) // m * m


def _vmem_budget():
    """Per-generation VMEM budget: (vmem_limit_bytes, max f32 bytes per DMA block)."""
    cap = None
    try:
        cap = int(getattr(pltpu.get_tpu_info(), "vmem_capacity_bytes", 0)) or None
    except Exception:
        cap = None
    if cap is None:
        cap = 64 * 1024 * 1024                          # conservative: v7x-class VMEM
    vmem_limit = min(cap * 3 // 4, 96 * 1024 * 1024)    # 48 MiB v7x, 96 MiB v5e/v6e
    # 2x(in) + 2x(out) double buffers + ids + chunked temporaries must fit vmem_limit.
    max_block_bytes = min(vmem_limit // 6, 16 * 1024 * 1024)  # 8 MiB v7x / 16 MiB v5e,v6e
    return vmem_limit, max_block_bytes


def _pick_lane_width(N):
    """Lane width L (multiple of 128) + padded feature count (multiple of L).
    Prefers exact divisors of N => zero wrapper padding, no extra HBM pass."""
    for L in (2048, 1536, 1024, 768, 512, 384, 256, 128):
        if N % L == 0:
            return L, N
    for L in (1024, 512, 256, 128):           # rare ragged case: tiny (<2%) lane pad
        N_pad = _round_up(N, L)
        if (N_pad - N) * 50 <= N:
            return L, N_pad
    return 128, _round_up(N, 128)


def _pick_batch_tile(B, L):
    """Largest divisor of B such that one 32-row compute chunk (TB*32*L f32)
    stays within the in-kernel working-set budget."""
    tb_max = max(1, _CHUNK_ELEMS // (32 * L))
    tb = 1
    for d in range(1, B + 1):
        if B % d == 0 and d <= tb_max:
            tb = d
    return tb


def _pick_rows(G, L, TB, batch_steps, max_block_bytes):
    """Feature rows per DMA block: as many 32-row groups as the per-block byte
    budget allows, shrunk only to guarantee a few parallel grid steps (megacore)."""
    if G <= 32:
        return G                                # whole (tiny) feature axis in one block
    r_budget = max(32, (max_block_bytes // (4 * TB * L) // 32) * 32)
    R = min((G // 32) * 32, r_budget)
    steps = pl.cdiv(G, R) * batch_steps
    while steps < 4 and R > 32:                 # give v7x's two TensorCores some steps
        R = max(32, ((R // 2) // 32) * 32)
        steps = pl.cdiv(G, R) * batch_steps
    return R


def _apply_activations(x, ids):
    """Integer-dispatched activation bank (ids outside 0..7 -> identity)."""
    neg = x < 0.0
    xpos = jnp.maximum(x, 0.0)                  # shared by relu and softplus
    e = jnp.exp(-jnp.abs(x))                    # single shared transcendental, no overflow

    # sigmoid / tanh denominators via EUP approx reciprocal + one Newton step
    # (moves divides off the VALU slot while keeping the 2e-5 tolerance).
    den1 = 1.0 + e
    inv1 = pl.reciprocal(den1, approx=True)
    inv1 = inv1 * (2.0 - den1 * inv1)
    sig = jnp.where(neg, e, 1.0) * inv1         # sigmoid(x), both signs

    e2 = e * e
    den2 = 1.0 + e2
    inv2 = pl.reciprocal(den2, approx=True)
    inv2 = inv2 * (2.0 - den2 * inv2)
    tanh_abs = (1.0 - e2) * inv2                # tanh(|x|)

    out = x                                                               # 0: identity
    out = jnp.where(ids == 1, xpos, out)                                  # 1: relu
    out = jnp.where(ids == 2, sig, out)                                   # 2: sigmoid
    out = jnp.where(ids == 3, jnp.where(neg, -tanh_abs, tanh_abs), out)   # 3: tanh
    out = jnp.where(ids == 4, jnp.where(neg, 0.01 * x, x), out)           # 4: leaky_relu(0.01)
    out = jnp.where(ids == 5, jnp.where(neg, e - 1.0, x), out)            # 5: elu (e=exp(x), x<0)
    out = jnp.where(ids == 6, x * sig, out)                               # 6: swish / silu
    out = jnp.where(ids == 7, jnp.log1p(e) + xpos, out)                   # 7: softplus (stable)
    return out


def _make_kernel(rs):
    def kernel(x_ref, act_ref, o_ref):
        # x_ref/o_ref: (TB, R, L) f32; act_ref: (R, L) int8 (broadcast over batch).
        # Big DMA blocks, but compute is sub-tiled in `rs`-row chunks so the
        # live f32 temporaries never exceed a few MiB of VMEM/vregs.
        n_chunks = x_ref.shape[1] // rs
        if n_chunks <= 1:
            o_ref[...] = _apply_activations(x_ref[...], act_ref[...].astype(jnp.int32))
        else:
            def body(c, carry):
                r0 = pl.multiple_of(c * rs, rs)
                x = x_ref[:, pl.ds(r0, rs), :]
                ids = act_ref[pl.ds(r0, rs), :].astype(jnp.int32)
                o_ref[:, pl.ds(r0, rs), :] = _apply_activations(x, ids)
                return carry
            lax.fori_loop(0, n_chunks, body, 0)
    return kernel


def conv_layer_activation(x, activations):
    """x: (B, C, H, W); activations: (N,) int with N = C*H*W. Returns float32 NCHW."""
    B, C, H, W = x.shape
    N = C * H * W
    assert activations.shape == (N,)

    vmem_limit, max_block_bytes = _vmem_budget()
    L, N_pad = _pick_lane_width(N)
    G = N_pad // L
    TB = _pick_batch_tile(B, L)
    R = _pick_rows(G, L, TB, B // TB, max_block_bytes)
    RS = 32 if R % 32 == 0 else R               # R is a multiple of 32, or R == G <= 32

    x_flat = x.reshape(B, N).astype(jnp.float32)
    ids = activations.astype(jnp.int8)          # 4x less id HBM traffic than int32
    if N_pad != N:                              # rare: < L columns of lane padding only
        x_flat = jnp.pad(x_flat, ((0, 0), (0, N_pad - N)))
        ids = jnp.pad(ids, (0, N_pad - N))      # padded id 0 == identity on zeros

    x3 = x_flat.reshape(B, G, L)                # lane/sublane-dense slab (free reshape)
    ids2 = ids.reshape(G, L)

    out3 = pl.pallas_call(
        _make_kernel(RS),
        out_shape=jax.ShapeDtypeStruct((B, G, L), jnp.float32),
        grid_spec=pltpu.PrefetchScalarGridSpec(
            num_scalar_prefetch=0,
            # Feature axis OUTER, batch INNER: the (R, L) id block index is
            # unchanged across consecutive batch steps => Pallas skips its re-DMA.
            grid=(pl.cdiv(G, R), B // TB),
            in_specs=[
                pl.BlockSpec((TB, R, L), lambda i, b: (b, i, 0)),
                pl.BlockSpec((R, L), lambda i, b: (i, 0)),
            ],
            out_specs=pl.BlockSpec((TB, R, L), lambda i, b: (b, i, 0)),
        ),
        compiler_params=pltpu.CompilerParams(
            dimension_semantics=("parallel", "parallel"),
            vmem_limit_bytes=int(vmem_limit),
        ),
    )(x3, ids2)

    out = out3.reshape(B, N_pad)
    if N_pad != N:
        out = out[:, :N]
    return out.reshape(B, C, H, W)


def _reference(x, activations):
    """Independent pure-JAX reference of the per-feature activation dispatch."""
    B, C, H, W = x.shape
    N = C * H * W
    xf = x.reshape(B, N).astype(jnp.float32)
    ids = activations.reshape(1, N)
    sig = jax.nn.sigmoid(xf)
    bank = [
        xf,
        jnp.maximum(xf, 0.0),
        sig,
        jnp.tanh(xf),
        jnp.where(xf > 0.0, xf, 0.01 * xf),
        jnp.where(xf > 0.0, xf, jnp.expm1(xf)),
        xf * sig,
        jax.nn.softplus(xf),
    ]
    out = bank[0]
    for k in range(1, NUM_ACTIVATIONS):
        out = jnp.where(ids == k, bank[k], out)
    return out.reshape(B, C, H, W)


if __name__ == "__main__":
    key = jax.random.PRNGKey(0)

    # Primary small shape consistent with the module, plus two small extras that
    # exercise the ragged feature tail and the multi-chunk in-kernel sub-tiling.
    shapes = [
        (2, 4, 16, 16),     # single-block path (the canonical small demo shape)
        (2, 66, 32, 32),    # ragged feature-row tail (G=33, R=32)
        (2, 128, 64, 64),   # multi-chunk fori_loop sub-tiling path (R=64, RS=32)
    ]
    for (B, C, H, W) in shapes:
        N = C * H * W
        key, kx = jax.random.split(key)
        x = jax.random.normal(kx, (B, C, H, W), dtype=jnp.float32)
        # Deterministic per-feature activation selection (module's self.activations).
        activations = jnp.arange(N, dtype=jnp.int32) % NUM_ACTIVATIONS

        out = jax.block_until_ready(conv_layer_activation(x, activations))
        ref = _reference(x, activations)
        assert out.shape == x.shape and out.dtype == jnp.float32
        assert jnp.allclose(out, ref, atol=2e-5, rtol=2e-5), f"mismatch at {x.shape}"

    print("KERNEL_OK")
</pallas_src>

<mosaic_0001>
module attributes {stable_mosaic.version = 11 : i64} {
  func.func @kernel(%arg0: i32, %arg1: i32, %arg2: memref<2x1x1024xf32, #tpu.memory_space<vmem>>, %arg3: memref<1x1024xi8, #tpu.memory_space<vmem>>, %arg4: memref<2x1x1024xf32, #tpu.memory_space<vmem>>) attributes {dimension_semantics = [#tpu.dimension_semantics<parallel>, #tpu.dimension_semantics<parallel>], iteration_bounds = array<i64: 1, 1>, scalar_prefetch = 0 : i64, scratch_operands = 0 : i64, tpu.core_type = #tpu.core_type<tc>, window_params = [{transform_indices = @transform_0, window_bounds = array<i64: 2, 1, 1024>}, {transform_indices = @transform_1, window_bounds = array<i64: 1, 1024>}, {transform_indices = @transform_2, window_bounds = array<i64: 2, 1, 1024>}]} {
    %c0 = arith.constant 0 : index
    %c0_0 = arith.constant 0 : index
    %c0_1 = arith.constant 0 : index
    %0 = vector.load %arg2[%c0, %c0_0, %c0_1] : memref<2x1x1024xf32, #tpu.memory_space<vmem>>, vector<2x1x1024xf32>
    %c0_2 = arith.constant 0 : index
    %c0_3 = arith.constant 0 : index
    %1 = vector.load %arg3[%c0_2, %c0_3] : memref<1x1024xi8, #tpu.memory_space<vmem>>, vector<1x1024xi8>
    %2 = arith.extsi %1 : vector<1x1024xi8> to vector<1x1024xi32>
    %cst = arith.constant 0.000000e+00 : f32
    %3 = vector.broadcast %cst : f32 to vector<2x1x1024xf32>
    %4 = arith.cmpf olt, %0, %3 : vector<2x1x1024xf32>
    %cst_4 = arith.constant 0.000000e+00 : f32
    %5 = vector.broadcast %cst_4 : f32 to vector<2x1x1024xf32>
    %6 = arith.maximumf %0, %5 : vector<2x1x1024xf32>
    %7 = math.absf %0 : vector<2x1x1024xf32>
    %cst_5 = arith.constant 0.000000e+00 : f32
    %8 = vector.broadcast %cst_5 : f32 to vector<2x1x1024xf32>
    %9 = arith.subf %8, %7 : vector<2x1x1024xf32>
    %10 = math.exp %9 : vector<2x1x1024xf32>
    %cst_6 = arith.constant 1.000000e+00 : f32
    %11 = vector.broadcast %cst_6 : f32 to vector<2x1x1024xf32>
    %12 = arith.addf %11, %10 : vector<2x1x1024xf32>
    %13 = tpu.reciprocal %12 {approx = true} : vector<2x1x1024xf32> -> vector<2x1x1024xf32>
    %14 = arith.mulf %12, %13 : vector<2x1x1024xf32>
    %cst_7 = arith.constant 2.000000e+00 : f32
    %15 = vector.broadcast %cst_7 : f32 to vector<2x1x1024xf32>
    %16 = arith.subf %15, %14 : vector<2x1x1024xf32>
    %17 = arith.mulf %13, %16 : vector<2x1x1024xf32>
    %cst_8 = arith.constant 1.000000e+00 : f32
    %18 = vector.broadcast %cst_8 : f32 to vector<2x1x1024xf32>
    %19 = arith.select %4, %10, %18 : vector<2x1x1024xi1>, vector<2x1x1024xf32>
    %20 = arith.mulf %19, %17 : vector<2x1x1024xf32>
    %21 = arith.mulf %10, %10 : vector<2x1x1024xf32>
    %cst_9 = arith.constant 1.000000e+00 : f32
    %22 = vector.broadcast %cst_9 : f32 to vector<2x1x1024xf32>
    %23 = arith.addf %22, %21 : vector<2x1x1024xf32>
    %24 = tpu.reciprocal %23 {approx = true} : vector<2x1x1024xf32> -> vector<2x1x1024xf32>
    %25 = arith.mulf %23, %24 : vector<2x1x1024xf32>
    %cst_10 = arith.constant 2.000000e+00 : f32
    %26 = vector.broadcast %cst_10 : f32 to vector<2x1x1024xf32>
    %27 = arith.subf %26, %25 : vector<2x1x1024xf32>
    %28 = arith.mulf %24, %27 : vector<2x1x1024xf32>
    %cst_11 = arith.constant 1.000000e+00 : f32
    %29 = vector.broadcast %cst_11 : f32 to vector<2x1x1024xf32>
    %30 = arith.subf %29, %21 : vector<2x1x1024xf32>
    %31 = arith.mulf %30, %28 : vector<2x1x1024xf32>
    %c1_i32 = arith.constant 1 : i32
    %32 = vector.broadcast %c1_i32 : i32 to vector<1x1024xi32>
    %33 = arith.cmpi eq, %2, %32 : vector<1x1024xi32>
    %34 = vector.shape_cast %33 : vector<1x1024xi1> to vector<1x1x1024xi1>
    %35 = vector.broadcast %34 : vector<1x1x1024xi1> to vector<2x1x1024xi1>
    %36 = arith.select %35, %6, %0 : vector<2x1x1024xi1>, vector<2x1x1024xf32>
    %c2_i32 = arith.constant 2 : i32
    %37 = vector.broadcast %c2_i32 : i32 to vector<1x1024xi32>
    %38 = arith.cmpi eq, %2, %37 : vector<1x1024xi32>
    %39 = vector.shape_cast %38 : vector<1x1024xi1> to vector<1x1x1024xi1>
    %40 = vector.broadcast %39 : vector<1x1x1024xi1> to vector<2x1x1024xi1>
    %41 = arith.select %40, %20, %36 : vector<2x1x1024xi1>, vector<2x1x1024xf32>
    %c3_i32 = arith.constant 3 : i32
    %42 = vector.broadcast %c3_i32 : i32 to vector<1x1024xi32>
    %43 = arith.cmpi eq, %2, %42 : vector<1x1024xi32>
    %cst_12 = arith.constant 0.000000e+00 : f32
    %44 = vector.broadcast %cst_12 : f32 to vector<2x1x1024xf32>
    %45 = arith.subf %44, %31 : vector<2x1x1024xf32>
    %46 = arith.select %4, %45, %31 : vector<2x1x1024xi1>, vector<2x1x1024xf32>
    %47 = vector.shape_cast %43 : vector<1x1024xi1> to vector<1x1x1024xi1>
    %48 = vector.broadcast %47 : vector<1x1x1024xi1> to vector<2x1x1024xi1>
    %49 = arith.select %48, %46, %41 : vector<2x1x1024xi1>, vector<2x1x1024xf32>
    %c4_i32 = arith.constant 4 : i32
    %50 = vector.broadcast %c4_i32 : i32 to vector<1x1024xi32>
    %51 = arith.cmpi eq, %2, %50 : vector<1x1024xi32>
    %cst_13 = arith.constant 0.00999999977 : f32
    %52 = vector.broadcast %cst_13 : f32 to vector<2x1x1024xf32>
    %53 = arith.mulf %52, %0 : vector<2x1x1024xf32>
    %54 = arith.select %4, %53, %0 : vector<2x1x1024xi1>, vector<2x1x1024xf32>
    %55 = vector.shape_cast %51 : vector<1x1024xi1> to vector<1x1x1024xi1>
    %56 = vector.broadcast %55 : vector<1x1x1024xi1> to vector<2x1x1024xi1>
    %57 = arith.select %56, %54, %49 : vector<2x1x1024xi1>, vector<2x1x1024xf32>
    %c5_i32 = arith.constant 5 : i32
    %58 = vector.broadcast %c5_i32 : i32 to vector<1x1024xi32>
    %59 = arith.cmpi eq, %2, %58 : vector<1x1024xi32>
    %cst_14 = arith.constant 1.000000e+00 : f32
    %60 = vector.broadcast %cst_14 : f32 to vector<2x1x1024xf32>
    %61 = arith.subf %10, %60 : vector<2x1x1024xf32>
    %62 = arith.select %4, %61, %0 : vector<2x1x1024xi1>, vector<2x1x1024xf32>
    %63 = vector.shape_cast %59 : vector<1x1024xi1> to vector<1x1x1024xi1>
    %64 = vector.broadcast %63 : vector<1x1x1024xi1> to vector<2x1x1024xi1>
    %65 = arith.select %64, %62, %57 : vector<2x1x1024xi1>, vector<2x1x1024xf32>
    %c6_i32 = arith.constant 6 : i32
    %66 = vector.broadcast %c6_i32 : i32 to vector<1x1024xi32>
    %67 = arith.cmpi eq, %2, %66 : vector<1x1024xi32>
    %68 = arith.mulf %0, %20 : vector<2x1x1024xf32>
    %69 = vector.shape_cast %67 : vector<1x1024xi1> to vector<1x1x1024xi1>
    %70 = vector.broadcast %69 : vector<1x1x1024xi1> to vector<2x1x1024xi1>
    %71 = arith.select %70, %68, %65 : vector<2x1x1024xi1>, vector<2x1x1024xf32>
    %c7_i32 = arith.constant 7 : i32
    %72 = vector.broadcast %c7_i32 : i32 to vector<1x1024xi32>
    %73 = arith.cmpi eq, %2, %72 : vector<1x1024xi32>
    %74 = math.log1p %10 : vector<2x1x1024xf32>
    %75 = arith.addf %74, %6 : vector<2x1x1024xf32>
    %76 = vector.shape_cast %73 : vector<1x1024xi1> to vector<1x1x1024xi1>
    %77 = vector.broadcast %76 : vector<1x1x1024xi1> to vector<2x1x1024xi1>
    %78 = arith.select %77, %75, %71 : vector<2x1x1024xi1>, vector<2x1x1024xf32>
    %c0_15 = arith.constant 0 : index
    %c0_16 = arith.constant 0 : index
    %c0_17 = arith.constant 0 : index
    %79 = vector.load %arg4[%c0_15, %c0_16, %c0_17] : memref<2x1x1024xf32, #tpu.memory_space<vmem>>, vector<2x1x1024xf32>
    tpu.vector_store %arg4[%c0_15, %c0_16, %c0_17], %78 {strides = array<i32>} : memref<2x1x1024xf32, #tpu.memory_space<vmem>>, vector<2x1x1024xf32>,
    return
  }
  func.func @transform_0(%arg0: i32, %arg1: i32) -> (i32, i32, i32) {
    %c0_i32 = arith.constant 0 : i32
    %c0_i32_0 = arith.constant 0 : i32
    return %arg1, %arg0, %c0_i32 : i32, i32, i32
  }
  func.func @transform_1(%arg0: i32, %arg1: i32) -> (i32, i32) {
    %c0_i32 = arith.constant 0 : i32
    %c0_i32_0 = arith.constant 0 : i32
    return %arg0, %c0_i32 : i32, i32
  }
  func.func @transform_2(%arg0: i32, %arg1: i32) -> (i32, i32, i32) {
    %c0_i32 = arith.constant 0 : i32
    %c0_i32_0 = arith.constant 0 : i32
    return %arg1, %arg0, %c0_i32 : i32, i32, i32
  }
}

</mosaic_0001>

<bundles_post_ra>
// kernel: tpu_custom_call.1
= control target key start
LH: loop header
LB: loop body
LE: loop exit
PB: predicated region body
PF: predicated region fallthrough
CT: control target
= control target key end

     0   :  { %7 = vsyncpa [#allocation3], 0  ;;  %s1520_s0 = inlined_call_operand.hbm [shape: f32[2,1,1024], index: 0, kind: input, shape index: {}]   ;;  %s1521_s1 = inlined_call_operand.hbm [shape: s8[1,1024], index: 1, kind: input, shape index: {}]   ;;  %s1522_s2 = inlined_call_operand.hbm [shape: f32[2,1,1024], index: 2, kind: output, shape index: {}]  }
   0x1   :  { %8 = vsyncpa [#allocation6], 0 }
   0x2   :  { %9 = vsyncpa [#allocation4], 0  ;;  %s1009_s9 = smov [#allocation2]   ;;  %s937_s13 = scalar_lea.hbm %s1520_s0, 256 }
   0x3   :  { %s15_s10 = sshll.u32 %s1009_s9, 4  ;;  %p938_p0 = scmp.ne.s32.totalorder %s1520_s0, %s937_s13  ;;  %s16_s10 = int_to_ptr.vmem [resolvable:$true] %s15_s10 }
   0x4   :  { %p941_p1 = scmp.lt.u32.totalorder %s937_s13, %s1520_s0 }
   0x6   :  { %p943_p2 = pnand %p941_p1, %p938_p0 }
   0x8   :  { %946 = shalt.err (!%p943_p2)
}
   0x9   :  { %s947_s18 = scalar_lea.vmem %s16_s10, 256  ;;  %p952_p4 = scmp.lt.s32.totalorder %s16_s10, %s16_s10 }
   0xa   :  { %p948_p3 = scmp.ne.s32.totalorder %s16_s10, %s947_s18  ;;  %p953_p5 = scmp.lt.s32.totalorder %s947_s18, %s947_s18 }
   0xc   :  { %p954_p6 = por %p953_p5, %p952_p4 }
   0xe   :  { %p955_p7 = pnand %p954_p6, %p948_p3 }
  0x10   :  { %958 = shalt.err (!%p955_p7)
}
  0x11   :  { %s1010_s19 = smov 128   ;;  %s1011_s20 = smov 8  }
  0x12   :  { %21 = dma.hbm_to_vmem [thread:$0]  %s1520_s0, 256, %s16_s10, [#allocation3], %s1010_s19, %s1010_s19, %s1011_s20  }
  0x13   :  { %s1012_s23 = smov [#allocation5]   ;;  %s959_s27 = scalar_lea.hbm %s1521_s1, 128 }
  0x14   :  { %s28_s24 = sshll.u32 %s1012_s23, 4  ;;  %p960_p8 = scmp.ne.s32.totalorder %s1521_s1, %s959_s27  ;;  %s29_s24 = int_to_ptr.vmem [resolvable:$true] %s28_s24 }
  0x15   :  { %p963_p9 = scmp.lt.u32.totalorder %s959_s27, %s1521_s1 }
  0x17   :  { %p965_p10 = pnand %p963_p9, %p960_p8 }
  0x19   :  { %968 = shalt.err (!%p965_p10)
}
  0x1a   :  { %s969_s4 = scalar_lea.vmem %s29_s24, 128  ;;  %p974_p12 = scmp.lt.s32.totalorder %s29_s24, %s29_s24 }
  0x1b   :  { %p970_p11 = scmp.ne.s32.totalorder %s29_s24, %s969_s4  ;;  %p975_p13 = scmp.lt.s32.totalorder %s969_s4, %s969_s4 }
  0x1d   :  { %p976_p0 = por %p975_p13, %p974_p12 }
  0x1f   :  { %p977_p1 = pnand %p976_p0, %p970_p11 }
  0x21   :  { %980 = shalt.err (!%p977_p1)
}
  0x22   :  { %31 = dma.hbm_to_vmem [thread:$0]  %s1521_s1, 128, %s29_s24, [#allocation6]  }
  0x23   :  { %1003 = dma.done.wait [#allocation3], 256  }
  0x24   :  { %1004 = vsyncadd [#allocation3], 4294967040 }
  0x25   :  { %1005 = dma.done.wait [#allocation6], 128  }
  0x26   :  { %1006 = vsyncadd [#allocation6], 4294967168  ;;  %v1061_v0 = vld [vmem:[#allocation2] sm:$0xff]  ;;  %v1063_v1 = vld [vmem:[#allocation2 + $0x8] sm:$0xff]  ;;  %v104_v4 = vlaneseq  ;;  %v1013_v7 = vmov 286326784   ;;  %s1018_s1 = smov [#allocation7]  }
  0x27   :  { %v49_v2 = vand.u32 2147483647, %v1061_v0  ;;  %v50_v3 = vand.u32 2147483647, %v1063_v1  ;;  %v102_v8 = vunpack.c.l.s4 %v1013_v7  ;;  %v1014_v9 = vmov 858989090  }
  0x28   :  { %v109_v10 = vunpack.c.l.s4 %v1014_v9  ;;  %v1015_v11 = vmov 1431651396   ;;  %v1016_v15 = vmov 2004313702   ;;  %v1017_v17 = vmov 1966171168  }
  0x29   :  { %v51_v5 = vsub.f32 0.0, %v49_v2  ;;  %v52_v6 = vsub.f32 0.0, %v50_v3  ;;  %v116_v12 = vunpack.c.l.s4 %v1015_v11  ;;  %v123_v16 = vunpack.c.l.s4 %v1016_v15  ;;  %v40_v21 = vld [vmem:[#allocation5] sm:$0xff]  ;;  %s896_s6 = sshll.u32 %s1018_s1, 4  ;;  %s897_s6 = int_to_ptr.vmem [resolvable:$true] %s896_s6 }
  0x2a   :  { %v798_v18 = vunpack.c.l.s4 %v1017_v17  ;;  %v103_v19 = vunpack.c.0.s8 %v102_v8  ;;  %v105_v20 = vshrl.u32 %v104_v4, 7  ;;  %v110_v22 = vunpack.c.0.s8 %v109_v10  ;;  %s981_s7 = scalar_lea.vmem %s897_s6, 256  ;;  %p986_p3 = scmp.lt.s32.totalorder %s897_s6, %s897_s6 }
  0x2b   :  { %v53_v13 = vmul.f32 1.442695, %v51_v5  ;;  %v55_v14 = vmul.f32 1.442695, %v52_v6  ;;  %v117_v23 = vunpack.c.0.s8 %v116_v12  ;;  %v124_v24 = vunpack.c.0.s8 %v123_v16  ;;  %p982_p2 = scmp.ne.s32.totalorder %s897_s6, %s981_s7  ;;  %p987_p4 = scmp.lt.s32.totalorder %s981_s7, %s981_s7 }
  0x2c   :  { %v799_v25 = vunpack.c.0.s8 %v798_v18  ;;  %v1067_v26 = vunpack.c.0.s8 %v40_v21  ;;  %v1069_v27 = vunpack.c.1.s8 %v40_v21  ;;  %v1071_v28 = vunpack.c.2.s8 %v40_v21 }
  0x2d   :  { %921 = vpow2.f32 %v53_v13  ;;  %v1073_v29 = vsub.s32 %v103_v19, %v105_v20  ;;  %v1075_v30 = vunpack.c.3.s8 %v40_v21  ;;  %v1078_v31 = vmax.f32 %v1061_v0, 0.0  ;;  %p988_p5 = por %p987_p4, %p986_p3 }
  0x2e   :  { %923 = vpow2.f32 %v55_v14  ;;  %v1080_v32 = vsub.s32 %v110_v22, %v105_v20  ;;  %v1082_v33 = vsub.s32 %v117_v23, %v105_v20  ;;  %v1085_v34 = vmax.f32 %v1063_v1, 0.0 }
  0x2f   :  { %v1087_v35 = vsub.s32 %v124_v24, %v105_v20  ;;  %v1089_v36 = vsub.s32 %v799_v25, %v105_v20  ;;  %vm45_vm0 = vcmp.lt.f32.partialorder %v1061_v0, 0.0  ;;  %vm87_vm1 = vcmp.eq.s32.totalorder %v1067_v26, 1  ;;  %p989_p6 = pnand %p988_p5, %p982_p2 }
  0x30   :  { %vm88_vm2 = vcmp.eq.s32.totalorder %v1069_v27, 1  ;;  %vm89_vm3 = vcmp.eq.s32.totalorder %v1071_v28, 1  ;;  %vm90_vm4 = vcmp.eq.s32.totalorder %v1075_v30, 1  ;;  %v107_v37 = vrot.slane %v1078_v31, %v1073_v29 }
  0x31   :  { %v114_v38 = vrot.slane %v1078_v31, %v1080_v32  ;;  %v121_v39 = vrot.slane %v1078_v31, %v1082_v33  ;;  %v128_v41 = vrot.slane %v1078_v31, %v1087_v35  ;;  %v135_v42 = vrot.slane %v1085_v34, %v1073_v29 }
  0x32   :  { %v142_v43 = vrot.slane %v1085_v34, %v1080_v32  ;;  %v149_v44 = vrot.slane %v1085_v34, %v1082_v33  ;;  %v173_v48 = vrot.slane %v1061_v0, %v1073_v29  ;;  %v180_v49 = vrot.slane %v1061_v0, %v1080_v32 }
  0x33   :  { %v187_v52 = vrot.slane %v1061_v0, %v1082_v33  ;;  %v194_v53 = vrot.slane %v1061_v0, %v1087_v35  ;;  %v201_v55 = vrot.slane %v1063_v1, %v1073_v29  ;;  %v419_v56 = vmul.f32 0.01, %v1061_v0 }
  0x34   :  { %v208_v58 = vrot.slane %v1063_v1, %v1080_v32  ;;  %v420_v59 = vmul.f32 0.01, %v1063_v1  ;;  %v156_v60 = vrot.slane %v1085_v34, %v1087_v35  ;;  %v215_v61 = vrot.slane %v1063_v1, %v1082_v33 }
  0x35   :  { %v222_v62 = vrot.slane %v1063_v1, %v1087_v35  ;;  %vm46_vm5 = vcmp.lt.f32.partialorder %v1063_v1, 0.0  ;;  %v1149_v63 = vsel %vm87_vm1, %v107_v37, %v173_v48  ;;  %v1153_v2 = vsel %vm88_vm2, %v114_v38, %v180_v49 }
  0x36   :  { %v1157_v3 = vsel %vm89_vm3, %v121_v39, %v187_v52  ;;  %v1161_v4 = vsel %vm90_vm4, %v128_v41, %v194_v53  ;;  %v1166_v5 = vsel %vm45_vm0, %v419_v56, %v1061_v0  ;;  %v1171_v7 = vsel %vm87_vm1, %v135_v42, %v201_v55 }
  0x37   :  { %v1102_v40 = vpop.eup %921  ;;  %v1175_v8 = vsel %vm88_vm2, %v142_v43, %v208_v58  ;;  %v1180_v9 = vsel %vm46_vm5, %v420_v59, %v1063_v1  ;;  %v1184_v10 = vsel %vm89_vm3, %v149_v44, %v215_v61  ;;  %v1188_v11 = vsel %vm90_vm4, %v156_v60, %v222_v62 }
  0x38   :  { %v1112_v45 = vpop.eup %923  ;;  %v57_v46 = vadd.f32 1.0, %v1102_v40  ;;  %v1117_v47 = vmul.f32 %v1102_v40, %v1102_v40  ;;  %v909_v6 = vadd.f32 -1.0, %v1102_v40  ;;  %v439_v13 = vrot.slane %v1166_v5, %v1073_v29 }
  0x39   :  { %v58_v50 = vadd.f32 1.0, %v1112_v45  ;;  %v1126_v51 = vmul.f32 %v1112_v45, %v1112_v45  ;;  %v910_v12 = vadd.f32 -1.0, %v1112_v45  ;;  %v446_v14 = vrot.slane %v1166_v5, %v1080_v32 }
  0x3a   :  { %925 = vrcp.f32 %v57_v46  ;;  %v73_v54 = vadd.f32 1.0, %v1117_v47  ;;  %v453_v15 = vrot.slane %v1166_v5, %v1082_v33  ;;  %v460_v16 = vrot.slane %v1166_v5, %v1087_v35 }
  0x3b   :  { %927 = vrcp.f32 %v58_v50  ;;  %v74_v57 = vadd.f32 1.0, %v1126_v51  ;;  %v467_v17 = vrot.slane %v1180_v9, %v1073_v29  ;;  %v474_v18 = vrot.slane %v1180_v9, %v1080_v32 }
  0x3c   :  { %929 = vrcp.f32 %v73_v54  ;;  %v481_v19 = vrot.slane %v1180_v9, %v1082_v33  ;;  %v1208_v20 = vsel %vm45_vm0, %v909_v6, %v1061_v0  ;;  %v67_v21 = vsel %vm45_vm0, %v1102_v40, 1.0 }
  0x3d   :  { %931 = vrcp.f32 %v74_v57  ;;  %v68_v22 = vsel %vm46_vm5, %v1112_v45, 1.0  ;;  %v690_v24 = vmul.f32 -0.5, %v1102_v40  ;;  %v83_v37 = vsub.f32 1.0, %v1117_v47 }
  0x3e   :  { %933 = vlog2.f32 %v57_v46  ;;  %v84_v38 = vsub.f32 1.0, %v1126_v51  ;;  %vm239_vm6 = vcmp.eq.s32.totalorder %v1067_v26, 2  ;;  %v1225_v39 = vsel %vm46_vm5, %v910_v12, %v1063_v1 }
  0x3f   :  { %935 = vlog2.f32 %v58_v50  ;;  %v699_v41 = vmul.f32 -0.5, %v1112_v45  ;;  %vm240_vm7 = vcmp.eq.s32.totalorder %v1069_v27, 2  ;;  %vm241_vm8 = vcmp.eq.s32.totalorder %v1071_v28, 2 }
  0x40   :  { %vm242_vm9 = vcmp.eq.s32.totalorder %v1075_v30, 2  ;;  %v693_v52 = vand.u32 2147483647, %v1102_v40  ;;  %v702_v53 = vand.u32 2147483647, %v1112_v45  ;;  %v557_v59 = vrot.slane %v1225_v39, %v1073_v29 }
  0x41   :  { %v691_v60 = vadd.f32 1.0, %v690_v24  ;;  %v564_v6 = vrot.slane %v1225_v39, %v1080_v32  ;;  %v571_v47 = vrot.slane %v1225_v39, %v1082_v33  ;;  %vm325_vm12 = vcmp.eq.s32.totalorder %v1067_v26, 3 }
  0x42   :  { %vm1249_vm10 = vcmp.lt.f32.partialorder %v693_v52, 0.0004427343  ;;  %vm1253_vm11 = vcmp.lt.f32.partialorder %v702_v53, 0.0004427343  ;;  %vm326_vm13 = vcmp.eq.s32.totalorder %v1069_v27, 3  ;;  %vm327_vm14 = vcmp.eq.s32.totalorder %v1071_v28, 3 }
  0x43   :  { %vm328_vm15 = vcmp.eq.s32.totalorder %v1075_v30, 3  ;;  %vm505_vm2 = vcmp.eq.s32.totalorder %v1067_v26, 5  ;;  %vm506_vm3 = vcmp.eq.s32.totalorder %v1069_v27, 5  ;;  %vm507_vm4 = vcmp.eq.s32.totalorder %v1071_v28, 5 }
  0x44   :  { %v926_v25 = vpop.eup %925  ;;  %vm508_vm1 = vcmp.eq.s32.totalorder %v1075_v30, 5 }
  0x45   :  { %v928_v42 = vpop.eup %927  ;;  %v61_v43 = vmul.f32 %v926_v25, %v57_v46 }
  0x46   :  { %v930_v49 = vpop.eup %929  ;;  %v62_v51 = vmul.f32 %v928_v42, %v58_v50  ;;  %v700_v50 = vadd.f32 1.0, %v699_v41 }
  0x47   :  { %v932_v55 = vpop.eup %931  ;;  %v63_v56 = vsub.f32 2.0, %v61_v43  ;;  %v77_v58 = vmul.f32 %v930_v49, %v73_v54  ;;  %v578_v43 = vrot.slane %v1225_v39, %v1087_v35 }
  0x48   :  { %v64_v61 = vsub.f32 2.0, %v62_v51  ;;  %v78_v62 = vmul.f32 %v932_v55, %v74_v57  ;;  %v934_v12 = vpop.eup %933  ;;  %v692_v51 = vmul.f32 %v1102_v40, %v691_v60  ;;  %v701_v53 = vmul.f32 %v1112_v45, %v700_v50 }
  0x49   :  { %v65_v48 = vmul.f32 %v926_v25, %v63_v56  ;;  %v79_v46 = vsub.f32 2.0, %v77_v58  ;;  %v936_v54 = vpop.eup %935 }
  0x4a   :  { %v66_v44 = vmul.f32 %v928_v42, %v64_v61  ;;  %v80_v23 = vsub.f32 2.0, %v78_v62  ;;  %v689_v42 = vmul.f32 0.6931472, %v934_v12  ;;  %v698_v58 = vmul.f32 0.6931472, %v936_v54 }
  0x4b   :  { %v69_v41 = vmul.f32 %v67_v21, %v65_v48  ;;  %v81_v25 = vmul.f32 %v930_v49, %v79_v46 }
  0x4c   :  { %v70_v52 = vmul.f32 %v68_v22, %v66_v44  ;;  %v82_v56 = vmul.f32 %v932_v55, %v80_v23 }
  0x4d   :  { %v85_v61 = vmul.f32 %v83_v37, %v81_v25  ;;  %v259_v21 = vrot.slane %v69_v41, %v1073_v29  ;;  %v266_v48 = vrot.slane %v69_v41, %v1080_v32  ;;  %v273_v49 = vrot.slane %v69_v41, %v1082_v33 }
  0x4e   :  { %v86_v40 = vmul.f32 %v84_v38, %v82_v56  ;;  %v280_v22 = vrot.slane %v69_v41, %v1087_v35  ;;  %v287_v45 = vrot.slane %v70_v52, %v1073_v29  ;;  %v294_v23 = vrot.slane %v70_v52, %v1080_v32 }
  0x4f   :  { %v301_v37 = vrot.slane %v70_v52, %v1082_v33  ;;  %v308_v44 = vrot.slane %v70_v52, %v1087_v35  ;;  %v317_v46 = vsel %vm239_vm6, %v259_v21, %v1149_v63  ;;  %v695_v38 = vsel %vm1249_vm10, %v692_v51, %v689_v42 }
  0x50   :  { %v318_v55 = vsel %vm240_vm7, %v266_v48, %v1153_v2  ;;  %v319_v60 = vsel %vm241_vm8, %v273_v49, %v1157_v3  ;;  %v320_v63 = vsel %vm242_vm9, %v280_v22, %v1161_v4  ;;  %v321_v62 = vsel %vm239_vm6, %v287_v45, %v1171_v7 }
  0x51   :  { %v322_v50 = vsel %vm240_vm7, %v294_v23, %v1175_v8  ;;  %v323_v2 = vsel %vm241_vm8, %v301_v37, %v1184_v10  ;;  %v329_v12 = vsub.f32 0.0, %v85_v61  ;;  %v330_v54 = vsub.f32 0.0, %v86_v40 }
  0x52   :  { %v324_v3 = vsel %vm242_vm9, %v308_v44, %v1188_v11  ;;  %v599_v4 = vmul.f32 %v69_v41, %v1061_v0  ;;  %v1307_v24 = vmul.f32 %v70_v52, %v1063_v1  ;;  %v704_v7 = vsel %vm1253_vm11, %v701_v53, %v698_v58 }
  0x53   :  { %v331_v8 = vsel %vm45_vm0, %v329_v12, %v85_v61  ;;  %v332_v10 = vsel %vm46_vm5, %v330_v54, %v86_v40  ;;  %vm595_vm6 = vcmp.eq.s32.totalorder %v1067_v26, 6  ;;  %vm596_vm7 = vcmp.eq.s32.totalorder %v1069_v27, 6 }
  0x54   :  { %vm597_vm8 = vcmp.eq.s32.totalorder %v1071_v28, 6  ;;  %vm598_vm9 = vcmp.eq.s32.totalorder %v1075_v30, 6  ;;  %v1320_v11 = vadd.f32 %v695_v38, %v1078_v31  ;;  %v1323_v57 = vadd.f32 %v704_v7, %v1085_v34 }
  0x55   :  { %v349_v0 = vrot.slane %v331_v8, %v1073_v29  ;;  %v356_v41 = vrot.slane %v331_v8, %v1080_v32  ;;  %v363_v1 = vrot.slane %v331_v8, %v1082_v33  ;;  %v370_v25 = vrot.slane %v331_v8, %v1087_v35 }
  0x56   :  { %v377_v42 = vrot.slane %v332_v10, %v1073_v29  ;;  %v384_v51 = vrot.slane %v332_v10, %v1080_v32  ;;  %v391_v52 = vrot.slane %v332_v10, %v1082_v33  ;;  %v398_v31 = vrot.slane %v332_v10, %v1087_v35 }
  0x57   :  { %v407_v34 = vsel %vm325_vm12, %v349_v0, %v317_v46  ;;  %v408_v56 = vsel %vm326_vm13, %v356_v41, %v318_v55  ;;  %v409_v58 = vsel %vm327_vm14, %v363_v1, %v319_v60  ;;  %v410_v53 = vsel %vm328_vm15, %v370_v25, %v320_v63 }
  0x58   :  { %v411_v61 = vsel %vm325_vm12, %v377_v42, %v321_v62  ;;  %v412_v21 = vsel %vm326_vm13, %v384_v51, %v322_v50  ;;  %v413_v48 = vsel %vm327_vm14, %v391_v52, %v323_v2  ;;  %v414_v49 = vsel %vm328_vm15, %v398_v31, %v324_v3 }
  0x59   :  { %vm683_vm0 = vcmp.eq.s32.totalorder %v1067_v26, 7  ;;  %vm684_vm5 = vcmp.eq.s32.totalorder %v1069_v27, 7  ;;  %vm685_vm10 = vcmp.eq.s32.totalorder %v1071_v28, 7  ;;  %vm686_vm11 = vcmp.eq.s32.totalorder %v1075_v30, 7 }
  0x5a   :  { %vm1527_vm12 = vcmp.eq.s32.totalorder %v1067_v26, 4  ;;  %vm1528_vm13 = vcmp.eq.s32.totalorder %v1069_v27, 4  ;;  %vm1529_vm14 = vcmp.eq.s32.totalorder %v1071_v28, 4  ;;  %vm1530_vm15 = vcmp.eq.s32.totalorder %v1075_v30, 4 }
  0x5b   :  { %v497_v40 = vsel %vm1527_vm12, %v439_v13, %v407_v34  ;;  %v498_v22 = vsel %vm1528_vm13, %v446_v14, %v408_v56  ;;  %v499_v45 = vsel %vm1529_vm14, %v453_v15, %v409_v58  ;;  %v500_v23 = vsel %vm1530_vm15, %v460_v16, %v410_v53 }
  0x5c   :  { %v501_v13 = vsel %vm1527_vm12, %v467_v17, %v411_v61  ;;  %v502_v14 = vsel %vm1528_vm13, %v474_v18, %v412_v21  ;;  %v503_v5 = vsel %vm1529_vm14, %v481_v19, %v413_v48  ;;  %v1531_v15 = vrot.slane %v1180_v9, %v1087_v35 }
  0x5d   :  { %v1532_v17 = vrot.slane %v1208_v20, %v1073_v29  ;;  %v1533_v18 = vrot.slane %v1208_v20, %v1080_v32  ;;  %v1534_v19 = vrot.slane %v1208_v20, %v1082_v33  ;;  %v1535_v46 = vrot.slane %v1208_v20, %v1087_v35 }
  0x5e   :  { %v504_v16 = vsel %vm1530_vm15, %v1531_v15, %v414_v49  ;;  %v591_v55 = vsel %vm505_vm2, %v557_v59, %v501_v13  ;;  %v592_v60 = vsel %vm506_vm3, %v564_v6, %v502_v14  ;;  %v593_v20 = vsel %vm507_vm4, %v571_v47, %v503_v5 }
  0x5f   :  { %v587_v37 = vsel %vm505_vm2, %v1532_v17, %v497_v40  ;;  %v588_v44 = vsel %vm506_vm3, %v1533_v18, %v498_v22  ;;  %v589_v9 = vsel %vm507_vm4, %v1534_v19, %v499_v45  ;;  %v590_v38 = vsel %vm508_vm1, %v1535_v46, %v500_v23 }
  0x60   :  { %v594_v63 = vsel %vm508_vm1, %v578_v43, %v504_v16  ;;  %v617_v59 = vrot.slane %v599_v4, %v1073_v29  ;;  %v624_v62 = vrot.slane %v599_v4, %v1080_v32  ;;  %v631_v50 = vrot.slane %v599_v4, %v1082_v33 }
  0x61   :  { %v638_v6 = vrot.slane %v599_v4, %v1087_v35  ;;  %v645_v2 = vrot.slane %v1307_v24, %v1073_v29  ;;  %v652_v47 = vrot.slane %v1307_v24, %v1080_v32  ;;  %v659_v39 = vrot.slane %v1307_v24, %v1082_v33 }
  0x62   :  { %v666_v43 = vrot.slane %v1307_v24, %v1087_v35  ;;  %v675_v12 = vsel %vm595_vm6, %v617_v59, %v587_v37  ;;  %v676_v54 = vsel %vm596_vm7, %v624_v62, %v588_v44  ;;  %v677_v3 = vsel %vm597_vm8, %v631_v50, %v589_v9 }
  0x63   :  { %v678_v4 = vsel %vm598_vm9, %v638_v6, %v590_v38  ;;  %v679_v7 = vsel %vm595_vm6, %v645_v2, %v591_v55  ;;  %v680_v8 = vsel %vm596_vm7, %v652_v47, %v592_v60  ;;  %v681_v24 = vsel %vm597_vm8, %v659_v39, %v593_v20 }
  0x64   :  { %v682_v10 = vsel %vm598_vm9, %v666_v43, %v594_v63  ;;  %v723_v0 = vrot.slane %v1320_v11, %v1073_v29  ;;  %v730_v41 = vrot.slane %v1320_v11, %v1080_v32  ;;  %v737_v1 = vrot.slane %v1320_v11, %v1082_v33 }
  0x65   :  { %v744_v25 = vrot.slane %v1320_v11, %v1087_v35  ;;  %v751_v42 = vrot.slane %v1323_v57, %v1073_v29  ;;  %v758_v51 = vrot.slane %v1323_v57, %v1080_v32  ;;  %v765_v52 = vrot.slane %v1323_v57, %v1082_v33 }
  0x66   :  { %v772_v31 = vrot.slane %v1323_v57, %v1087_v35  ;;  %v781_v34 = vsel %vm683_vm0, %v723_v0, %v675_v12  ;;  %v782_v56 = vsel %vm684_vm5, %v730_v41, %v676_v54  ;;  %v783_v11 = vsel %vm685_vm10, %v737_v1, %v677_v3 }
  0x67   :  { %v784_v29 = vsel %vm686_vm11, %v744_v25, %v678_v4  ;;  %v785_v32 = vsel %vm683_vm0, %v751_v42, %v679_v7  ;;  %v786_v33 = vsel %vm684_vm5, %v758_v51, %v680_v8  ;;  %v787_v35 = vsel %vm685_vm10, %v765_v52, %v681_v24 }
  0x68   :  { %v788_v57 = vsel %vm686_vm11, %v772_v31, %v682_v10  ;;  %v803_v58 = vrot.slane %v781_v34, %v1089_v36  ;;  %v810_v53 = vrot.slane %v782_v56, %v1089_v36  ;;  %v817_v61 = vrot.slane %v783_v11, %v1089_v36 }
  0x69   :  { %v824_v21 = vrot.slane %v784_v29, %v1089_v36  ;;  %v848_v26 = vrot.slane %v785_v32, %v1089_v36  ;;  %v855_v48 = vrot.slane %v786_v33, %v1089_v36  ;;  %v862_v27 = vrot.slane %v787_v35, %v1089_v36 }
  0x6a   :  { %v869_v28 = vrot.slane %v788_v57, %v1089_v36  ;;  %v825_v49 = vcombine.low %v803_v58, %v810_v53 }
  0x6b   :  { %v826_v40 = vcombine.low %v817_v61, %v824_v21  ;;  %v870_v30 = vcombine.low %v848_v26, %v855_v48 }
  0x6c   :  { %v871_v22 = vcombine.low %v862_v27, %v869_v28  ;;  %v833_v45 = vrot.slane %v825_v49, %v1089_v36 }
  0x6d   :  { %v840_v23 = vrot.slane %v826_v40, %v1089_v36  ;;  %v878_v13 = vrot.slane %v870_v30, %v1089_v36 }
  0x6e   :  { %v885_v14 = vrot.slane %v871_v22, %v1089_v36 }
  0x6f   :  { %v841_v5 = vcombine.low %v833_v45, %v840_v23 }
  0x70   :  { %v886_v15 = vcombine.low %v878_v13, %v885_v14 }
  0x71   :  { %889 = vst [vmem:[#allocation7] sm:$0xff] %v841_v5 }
  0x72   :  { %890 = vst [vmem:[#allocation7 + $0x8] sm:$0xff] %v886_v15 }
  0x73   :  { %992 = shalt.err (!%p989_p6)
}
  0x74   :  { %s993_s10 = scalar_lea.hbm %s1522_s2, 256 }
  0x75   :  { %p994_p7 = scmp.ne.s32.totalorder %s1522_s2, %s993_s10  ;;  %p997_p8 = scmp.lt.u32.totalorder %s993_s10, %s1522_s2 }
  0x77   :  { %p999_p9 = pnand %p997_p8, %p994_p7 }
  0x79   :  { %1002 = shalt.err (!%p999_p9)
}
  0x7a   :  { %902 = dma.vmem_to_hbm [thread:$0]  %s897_s6, 256, %s1522_s2, [#allocation4], %s1010_s19, %s1010_s19, %s1011_s20  }
  0x7b   :  { %1007 = dma.done.wait [#allocation4], 256  }
  0x7c   :  { %1008 = vsyncadd [#allocation4], 4294967040 }
  0x7d   :  { %906 = vsyncpa [#allocation3], 1 }
  0x7e   :  { %907 = vsyncpa [#allocation6], 1 }
  0x7f   :  { %908 = vsyncpa [#allocation4], 1 }

</bundles_post_ra>
